<compile_context>
chip_gen: v6e
topology: v6e:2x2x1
jax: 0.10.0
libtpu: 0.0.40
codegen_flags: <defaults>
</compile_context>

<pallas_src>
import functools
import math

import jax
import jax.numpy as jnp
from jax import lax
from jax.experimental import pallas as pl
from jax.experimental.pallas import tpu as pltpu


# ----------------------------------------------------------------------------
# Kernel A: lane-dense channel sum (f32) + channel max, accumulated across the
# channel-tile grid axis directly into the resident output blocks.
# ----------------------------------------------------------------------------
def _channel_reduce_kernel(x_ref, sum_ref, max_ref, *, c_tile, chunk):
    # x_ref:   VMEM (c_tile, H*W)  — one channel tile of one image, lane-dense
    # sum_ref: VMEM (1, H*W) f32   — resident output: channel sum
    # max_ref: VMEM (1, H*W) f32   — resident output: channel max
    c = pl.program_id(1)

    def tile_sum_max(blk):
        s = jnp.sum(blk.astype(jnp.float32), axis=0, keepdims=True)
        m = jnp.max(blk, axis=0, keepdims=True).astype(jnp.float32)
        return s, m

    if c_tile > chunk and c_tile % chunk == 0:
        # Fused single pass in sublane-tile sized chunks: bounds the f32
        # upcast temporary to (chunk, H*W) instead of the whole block and
        # reads each input vreg exactly once for both sum and max.
        part_sum, part_max = tile_sum_max(x_ref[pl.ds(0, chunk), :])

        def body(i, carry):
            s, m = carry
            start = pl.multiple_of(i * chunk, chunk)
            ps, pm = tile_sum_max(x_ref[pl.ds(start, chunk), :])
            return s + ps, jnp.maximum(m, pm)

        part_sum, part_max = lax.fori_loop(
            1, c_tile // chunk, body, (part_sum, part_max))
    else:
        part_sum, part_max = tile_sum_max(x_ref[...])

    # First channel tile of this image: write directly (no zero/-inf init +
    # read-modify-write). Subsequent tiles: accumulate.
    @pl.when(c == 0)
    def _init():
        sum_ref[...] = part_sum
        max_ref[...] = part_max

    @pl.when(c > 0)
    def _accumulate():
        sum_ref[...] = sum_ref[...] + part_sum
        max_ref[...] = jnp.maximum(max_ref[...], part_max)


# ----------------------------------------------------------------------------
# Kernel B: zero-padded 7x7 (2 -> 1) conv + bias + sigmoid on the two reduced
# maps of one image.
# ----------------------------------------------------------------------------
def _conv_sigmoid_kernel(avgsum_ref, chmax_ref, params_ref, o_ref,
                         avg_pad_ref, max_pad_ref, *, K, H, W):
    # avgsum_ref / chmax_ref: VMEM (H, W) f32   — channel-sum / channel-max map
    # params_ref:             SMEM (2*K*K + 1,) — [w_avg/C | w_max | bias] f32
    # o_ref:                  VMEM (H, W)       — attention map for this image
    # avg_pad_ref/max_pad_ref: VMEM (H+2p, W+2p) f32 zero-padded scratch
    p = K // 2

    # Zero halo == PyTorch's zero padding of the concatenated [avg, max] conv
    # input (zero channels give mean=0 and max=0 at halo positions).  The
    # whole-buffer zero is ~(H+2p)*(W+2p) f32 per image (negligible) and keeps
    # the kernel correct under megacore splitting of the N axis (we cannot
    # gate on n == 0, since each core starts at a different n with
    # uninitialized scratch).
    avg_pad_ref[...] = jnp.zeros_like(avg_pad_ref)
    max_pad_ref[...] = jnp.zeros_like(max_pad_ref)
    avg_pad_ref[p:p + H, p:p + W] = avgsum_ref[...]   # 1/C folded into weights
    max_pad_ref[p:p + H, p:p + W] = chmax_ref[...]

    avg_pad = avg_pad_ref[...]                        # (Hp, Wp) f32
    max_pad = max_pad_ref[...]

    # Hoist the K lane-shifted windows per map once; reuse for all dy:
    # 2*K lane shifts + K sublane shifts instead of 2*K*K shifting slices.
    a_sh = [avg_pad[:, dx:dx + W] for dx in range(K)]  # each (Hp, W)
    m_sh = [max_pad[:, dx:dx + W] for dx in range(K)]

    acc = jnp.full((H, W), params_ref[2 * K * K], jnp.float32)   # bias
    for dy in range(K):
        comb = None
        for dx in range(K):
            w0 = params_ref[dy * K + dx]              # avg-branch weight (already /C)
            w1 = params_ref[K * K + dy * K + dx]      # max-branch weight
            t = w0 * a_sh[dx] + w1 * m_sh[dx]
            comb = t if comb is None else comb + t
        acc = acc + comb[dy:dy + H, :]                # single sublane shift per dy

    o_ref[...] = jax.nn.sigmoid(acc).astype(o_ref.dtype)


# ----------------------------------------------------------------------------
# Wrapper
# ----------------------------------------------------------------------------
def spatial_attention(x, weight, bias, *, kernel_size=7, c_tile=None):
    """x: (N, C, H, W); weight: (1, 2, K, K); bias: (1,). Returns (N, 1, H, W)."""
    N, C, H, W = x.shape
    K = kernel_size
    p = K // 2
    HW = H * W
    Hp, Wp = H + 2 * p, W + 2 * p

    itemsize = jnp.dtype(x.dtype).itemsize
    # Sublane-tile multiple for this dtype (8 for f32, 16 for bf16, 32 for i8):
    # used both as the layout-friendly c_tile granularity and as the in-kernel
    # reduction chunk.
    sub = max(8, 32 // itemsize)

    if c_tile is None:
        # Budget against the *lane-padded* VMEM footprint of a channel row:
        # ceil(H*W / 128) * 128 * itemsize bytes per channel.  ~8 MiB blocks
        # keep the fixed per-grid-step overhead (~0.35us) small relative to
        # the DMA time on v6e/v7x-class HBM, and double-buffered blocks stay
        # well under the 48 MiB vmem limit (itself under v7x's 64 MiB VMEM).
        budget = 8 * 1024 * 1024
        lane_hw = ((HW + 127) // 128) * 128
        per_ch = max(1, lane_hw * itemsize)
        max_ct = max(1, budget // per_ch)
        # Candidates: divisors of C that are layout-friendly for the
        # second-to-last block dim (multiple of the sublane tile, or C itself).
        cands = [d for d in range(1, C + 1)
                 if C % d == 0 and (d % sub == 0 or d == C)]
        fitting = [d for d in cands if d <= max_ct]
        c_tile = max(fitting) if fitting else min(cands)
    assert C % c_tile == 0, "c_tile must divide C"
    nc = C // c_tile

    # Conv params packed flat for SMEM: [w_avg / C | w_max | bias].
    # Folding 1/C into the avg-branch weights lets kernel A use a pure sum
    # (slightly different rounding order vs mean-then-conv; fine at f32).
    params = jnp.concatenate([
        (weight[0, 0] / C).reshape(-1),
        weight[0, 1].reshape(-1),
        bias.reshape(-1),
    ]).astype(jnp.float32)

    # Lane-dense view of the activation (free: contiguous reshape).
    x3 = x.reshape(N, C, HW)

    reduce_kernel = functools.partial(
        _channel_reduce_kernel, c_tile=c_tile, chunk=sub)
    sums, maxes = pl.pallas_call(
        reduce_kernel,
        out_shape=(jax.ShapeDtypeStruct((N, 1, HW), jnp.float32),
                   jax.ShapeDtypeStruct((N, 1, HW), jnp.float32)),
        grid=(N, nc),
        in_specs=[
            # one lane-dense channel tile of one image per grid step
            pl.BlockSpec((None, c_tile, HW), lambda n, c: (n, c, 0)),
        ],
        # same output block across the c (reduction) axis -> stays resident
        out_specs=(pl.BlockSpec((None, 1, HW), lambda n, c: (n, 0, 0)),
                   pl.BlockSpec((None, 1, HW), lambda n, c: (n, 0, 0))),
        compiler_params=pltpu.CompilerParams(
            dimension_semantics=("parallel", "arbitrary"),
            vmem_limit_bytes=48 * 1024 * 1024,
        ),
    )(x3)

    conv_kernel = functools.partial(_conv_sigmoid_kernel, K=K, H=H, W=W)
    out = pl.pallas_call(
        conv_kernel,
        out_shape=jax.ShapeDtypeStruct((N, 1, H, W), x.dtype),
        grid=(N,),
        in_specs=[
            pl.BlockSpec((None, H, W), lambda n: (n, 0, 0)),
            pl.BlockSpec((None, H, W), lambda n: (n, 0, 0)),
            # small scalar parameter table lives in SMEM (untiled)
            pl.BlockSpec(memory_space=pltpu.MemorySpace.SMEM),
        ],
        out_specs=pl.BlockSpec((None, None, H, W), lambda n: (n, 0, 0, 0)),
        scratch_shapes=[
            pltpu.VMEM((Hp, Wp), jnp.float32),    # zero-padded avg map
            pltpu.VMEM((Hp, Wp), jnp.float32),    # zero-padded max map
        ],
        compiler_params=pltpu.CompilerParams(
            dimension_semantics=("parallel",),
        ),
    )(sums.reshape(N, H, W), maxes.reshape(N, H, W), params)
    return out


def _reference(x, weight, bias):
    avg = jnp.mean(x, axis=1, keepdims=True)
    mx = jnp.max(x, axis=1, keepdims=True)
    inp = jnp.concatenate([avg, mx], axis=1)
    out = lax.conv_general_dilated(
        inp, weight, window_strides=(1, 1), padding="SAME",
        dimension_numbers=("NCHW", "OIHW", "NCHW"),
    ) + bias.reshape(1, 1, 1, 1)
    return jax.nn.sigmoid(out)


if __name__ == "__main__":
    key = jax.random.PRNGKey(0)
    kx1, kx2, kw, kb = jax.random.split(key, 4)

    K = 7
    # Deterministic Conv2d(2, 1, 7) init (PyTorch-style uniform bounds).
    fan_in = 2 * K * K
    bound = 1.0 / math.sqrt(fan_in)
    weight = jax.random.uniform(kw, (1, 2, K, K), jnp.float32, -bound, bound)
    bias = jax.random.uniform(kb, (1,), jnp.float32, -bound, bound)

    # Test 1: small module-consistent shape; auto c_tile (= C, single channel
    # step), whole-block reduction path.
    N1, C1, H1, W1 = 2, 4, 16, 16
    x1 = jax.random.normal(kx1, (N1, C1, H1, W1), dtype=jnp.float32)
    y1 = jax.block_until_ready(spatial_attention(x1, weight, bias, kernel_size=K))
    assert y1.shape == (N1, 1, H1, W1)
    assert jnp.allclose(y1, _reference(x1, weight, bias), atol=1e-5, rtol=1e-5), \
        "mismatch vs JAX reference (test 1)"

    # Test 2: more channels with an explicit c_tile -> exercises the
    # init/accumulate path across channel tiles and the chunked fused
    # sum/max reduction loop.
    N2, C2, H2, W2 = 2, 32, 16, 16
    x2 = jax.random.normal(kx2, (N2, C2, H2, W2), dtype=jnp.float32)
    y2 = jax.block_until_ready(
        spatial_attention(x2, weight, bias, kernel_size=K, c_tile=16))
    assert y2.shape == (N2, 1, H2, W2)
    assert jnp.allclose(y2, _reference(x2, weight, bias), atol=1e-5, rtol=1e-5), \
        "mismatch vs JAX reference (test 2)"

    print("KERNEL_OK")
</pallas_src>

<mosaic_0001>
module attributes {stable_mosaic.version = 11 : i64} {
  func.func @_channel_reduce_kernel(%arg0: i32, %arg1: i32, %arg2: memref<1x4x256xf32, #tpu.memory_space<vmem>>, %arg3: memref<1x1x256xf32, #tpu.memory_space<vmem>>, %arg4: memref<1x1x256xf32, #tpu.memory_space<vmem>>) attributes {dimension_semantics = [#tpu.dimension_semantics<parallel>, #tpu.dimension_semantics<arbitrary>], iteration_bounds = array<i64: 2, 1>, scalar_prefetch = 0 : i64, scratch_operands = 0 : i64, tpu.core_type = #tpu.core_type<tc>, window_params = [{transform_indices = @transform_0, window_bounds = array<i64: 1, 4, 256>}, {transform_indices = @transform_1, window_bounds = array<i64: 1, 1, 256>}, {transform_indices = @transform_2, window_bounds = array<i64: 1, 1, 256>}]} {
    %c0 = arith.constant 0 : index
    %c0_0 = arith.constant 0 : index
    %c0_1 = arith.constant 0 : index
    %0 = vector.load %arg2[%c0, %c0_0, %c0_1] : memref<1x4x256xf32, #tpu.memory_space<vmem>>, vector<1x4x256xf32>
    %1 = vector.shape_cast %0 : vector<1x4x256xf32> to vector<4x256xf32>
    %cst = arith.constant dense<0.000000e+00> : vector<256xf32>
    %2 = vector.multi_reduction <add>, %1, %cst [0] : vector<4x256xf32> to vector<256xf32>
    %3 = vector.shape_cast %2 : vector<256xf32> to vector<1x256xf32>
    %cst_2 = arith.constant dense<0xFF800000> : vector<256xf32>
    %4 = vector.multi_reduction <maximumf>, %1, %cst_2 [0] : vector<4x256xf32> to vector<256xf32>
    %5 = vector.shape_cast %4 : vector<256xf32> to vector<1x256xf32>
    %c0_i32 = arith.constant 0 : i32
    %6 = arith.cmpi eq, %arg1, %c0_i32 : i32
    %7 = arith.extui %6 : i1 to i32
    %c0_i32_3 = arith.constant 0 : i32
    %8 = arith.cmpi ne, %7, %c0_i32_3 : i32
    scf.if %8 {
      %c0_6 = arith.constant 0 : index
      %c0_7 = arith.constant 0 : index
      %c0_8 = arith.constant 0 : index
      %12 = vector.load %arg3[%c0_6, %c0_7, %c0_8] : memref<1x1x256xf32, #tpu.memory_space<vmem>>, vector<1x1x256xf32>
      %13 = vector.shape_cast %12 : vector<1x1x256xf32> to vector<1x256xf32>
      %14 = vector.shape_cast %3 : vector<1x256xf32> to vector<1x1x256xf32>
      tpu.vector_store %arg3[%c0_6, %c0_7, %c0_8], %14 {strides = array<i32>} : memref<1x1x256xf32, #tpu.memory_space<vmem>>, vector<1x1x256xf32>,
      %c0_9 = arith.constant 0 : index
      %c0_10 = arith.constant 0 : index
      %c0_11 = arith.constant 0 : index
      %15 = vector.load %arg4[%c0_9, %c0_10, %c0_11] : memref<1x1x256xf32, #tpu.memory_space<vmem>>, vector<1x1x256xf32>
      %16 = vector.shape_cast %15 : vector<1x1x256xf32> to vector<1x256xf32>
      %17 = vector.shape_cast %5 : vector<1x256xf32> to vector<1x1x256xf32>
      tpu.vector_store %arg4[%c0_9, %c0_10, %c0_11], %17 {strides = array<i32>} : memref<1x1x256xf32, #tpu.memory_space<vmem>>, vector<1x1x256xf32>,
    } else {
    }
    %c0_i32_4 = arith.constant 0 : i32
    %9 = arith.cmpi sgt, %arg1, %c0_i32_4 : i32
    %10 = arith.extui %9 : i1 to i32
    %c0_i32_5 = arith.constant 0 : i32
    %11 = arith.cmpi ne, %10, %c0_i32_5 : i32
    scf.if %11 {
      %c0_6 = arith.constant 0 : index
      %c0_7 = arith.constant 0 : index
      %c0_8 = arith.constant 0 : index
      %12 = vector.load %arg3[%c0_6, %c0_7, %c0_8] : memref<1x1x256xf32, #tpu.memory_space<vmem>>, vector<1x1x256xf32>
      %13 = vector.shape_cast %12 : vector<1x1x256xf32> to vector<1x256xf32>
      %14 = arith.addf %13, %3 : vector<1x256xf32>
      %c0_9 = arith.constant 0 : index
      %c0_10 = arith.constant 0 : index
      %c0_11 = arith.constant 0 : index
      %15 = vector.load %arg3[%c0_9, %c0_10, %c0_11] : memref<1x1x256xf32, #tpu.memory_space<vmem>>, vector<1x1x256xf32>
      %16 = vector.shape_cast %15 : vector<1x1x256xf32> to vector<1x256xf32>
      %17 = vector.shape_cast %14 : vector<1x256xf32> to vector<1x1x256xf32>
      tpu.vector_store %arg3[%c0_9, %c0_10, %c0_11], %17 {strides = array<i32>} : memref<1x1x256xf32, #tpu.memory_space<vmem>>, vector<1x1x256xf32>,
      %c0_12 = arith.constant 0 : index
      %c0_13 = arith.constant 0 : index
      %c0_14 = arith.constant 0 : index
      %18 = vector.load %arg4[%c0_12, %c0_13, %c0_14] : memref<1x1x256xf32, #tpu.memory_space<vmem>>, vector<1x1x256xf32>
      %19 = vector.shape_cast %18 : vector<1x1x256xf32> to vector<1x256xf32>
      %20 = arith.maximumf %19, %5 : vector<1x256xf32>
      %c0_15 = arith.constant 0 : index
      %c0_16 = arith.constant 0 : index
      %c0_17 = arith.constant 0 : index
      %21 = vector.load %arg4[%c0_15, %c0_16, %c0_17] : memref<1x1x256xf32, #tpu.memory_space<vmem>>, vector<1x1x256xf32>
      %22 = vector.shape_cast %21 : vector<1x1x256xf32> to vector<1x256xf32>
      %23 = vector.shape_cast %20 : vector<1x256xf32> to vector<1x1x256xf32>
      tpu.vector_store %arg4[%c0_15, %c0_16, %c0_17], %23 {strides = array<i32>} : memref<1x1x256xf32, #tpu.memory_space<vmem>>, vector<1x1x256xf32>,
    } else {
    }
    return
  }
  func.func @transform_0(%arg0: i32, %arg1: i32) -> (i32, i32, i32) {
    %c0_i32 = arith.constant 0 : i32
    %c0_i32_0 = arith.constant 0 : i32
    return %arg0, %arg1, %c0_i32 : i32, i32, i32
  }
  func.func @transform_1(%arg0: i32, %arg1: i32) -> (i32, i32, i32) {
    %c0_i32 = arith.constant 0 : i32
    %c0_i32_0 = arith.constant 0 : i32
    %c0_i32_1 = arith.constant 0 : i32
    return %arg0, %c0_i32, %c0_i32_0 : i32, i32, i32
  }
  func.func @transform_2(%arg0: i32, %arg1: i32) -> (i32, i32, i32) {
    %c0_i32 = arith.constant 0 : i32
    %c0_i32_0 = arith.constant 0 : i32
    %c0_i32_1 = arith.constant 0 : i32
    return %arg0, %c0_i32, %c0_i32_0 : i32, i32, i32
  }
}

</mosaic_0001>

<bundles_post_ra>
// kernel: tpu_custom_call.1
= control target key start
LH: loop header
LB: loop body
LE: loop exit
PB: predicated region body
PF: predicated region fallthrough
CT: control target
= control target key end

     0   :  { %8 = vsyncpa [#allocation3], 0  ;;  %s888_s0 = inlined_call_operand.hbm [shape: f32[2,4,256], index: 0, kind: input, shape index: {}]   ;;  %s889_s1 = inlined_call_operand.hbm [shape: f32[2,1,256], index: 1, kind: output, shape index: {0}]   ;;  %s890_s2 = inlined_call_operand.hbm [shape: f32[2,1,256], index: 2, kind: output, shape index: {1}]  }
   0x1   :  { %10 = vsyncpa [#allocation3 + $0x1], 0 }
   0x2   :  { %11 = vsyncpa [#allocation4], 0 }
   0x3   :  { %13 = vsyncpa [#allocation4 + $0x1], 0 }
   0x4   :  { %14 = vsyncpa [#allocation7], 0 }
   0x5   :  { %16 = vsyncpa [#allocation7 + $0x1], 0  ;;  %s713_s9 = smov 0   ;;  %s715_s10 = smov 0  }
   0x6   :  { %s717_s11 = smov 0   ;;  %s719_s12 = smov 0  }
   0x7   :  { %s721_s13 = smov 0   ;;  %s723_s14 = smov 0  }
   0x8 LB: > { %s463_s15 = sadd.s32 4294967295, %s692_s14   ;;  %s464_s16 = sadd.s32 4294967294, %s692_s14   ;;  %s692_s14 = sphi %s723_s14, %s22_s14   ;;  %s688_s13 = sphi %s721_s13, %s902_s13   ;;  %s684_s12 = sphi %s719_s12, %s901_s12   ;;  %s680_s11 = sphi %s717_s11, %s900_s11   ;;  %s676_s10 = sphi %s715_s10, %s899_s10   ;;  %s672_s9 = sphi %s713_s9, %s898_s9  }
   0x9   : > { %s34_s17 = sadd.s32 1, %s688_s13  ;;  %s43_s18 = sadd.s32 1, %s680_s11 }
   0xa   : > { %p36_p0 = scmp.ge.s32.totalorder %s34_s17, 2  ;;  %p50_p1 = scmp.ne.s32.totalorder %s680_s11, %s676_s10 }
   0xb   : > { %p51_p2 = scmp.eq.s32.totalorder %s692_s14, 0  ;;  %p56_p3 = scmp.ne.s32.totalorder %s676_s10, %s672_s9 }
   0xc   : > { %s904_s17 = smov (%p36_p0, %s34_s17), 0  ;;  %p57_p5 = scmp.eq.s32.totalorder %s463_s15, 0 }
   0xd   : > { %p754_p4 = por %p51_p2, %p50_p1  ;;  %s38_s20 = ssub.s32 %s688_s13, %s904_s17 }
   0xe   : > { %p80_p6 = scmp.eq.s32.totalorder %s463_s15, 1  ;;  %p41_p7 = scmp.eq.s32.totalorder %s38_s20, 0 }
   0xf   : > { %p760_p8 = por %p57_p5, %p56_p3  ;;  %p86_p10 = scmp.eq.s32.totalorder %s464_s16, 1 }
  0x10   : > { %p764_p9 = por %p80_p6, %p50_p1  ;;  %p502_p13 = scmp.lt.s32.totalorder %s692_s14, 2 }
  0x11   : > { %s769_s23 = scalar_select %p41_p7, %s680_s11, %s43_s18  }
  0x12   : > { %p771_p11 = por %p86_p10, %p56_p3  ;;  %s132_s25 = sand.u32 1, %s680_s11  }
  0x13   : > { %s467_s26 = sshll.u32 %s132_s25, 3  ;;  %s482_s27 = sshll.u32 %s688_s13, 7 }
  0x14   : > { %s894_s24 = scalar_select %p771_p11, 1, 0 }
  0x15   : > { %s144_s30 = scalar_lea.hbm %s888_s0, %s482_s27  ;;  %s136_s3 = scalar_lea.vmem [#allocation2], %s467_s26 }
  0x16   : > { %s146_s4 = sshll.u32 %s136_s3, 4  ;;  %p784_p0 = pnand %p502_p13, %p754_p4  ;;  %s147_s4 = int_to_ptr.vmem [resolvable:$true] %s146_s4 }
  0x17   : > { %p470_p1 = scmp.ge.s32.totalorder %s692_s14, 1  ;;  %p151_p2 = scmp.lt.s32.totalorder %s692_s14, 3 }
  0x18   : > { %s133_s6 = scalar_lea.sflag [#allocation3], %s132_s25  ;;  %p556_p3 = pneg %p784_p0 }
  0x19   : > { %s567_s7 = scalar_lea.vmem %s147_s4, 128  ;;  %s694_s8 = smov [#allocation2]  }
  0x1a   : > { %p568_p5 = scmp.ne.s32.totalorder %s147_s4, %s567_s7  ;;  %s572_s15 = sshll.u32 %s694_s8, 4  ;;  %s573_s15 = int_to_ptr.vmem [resolvable:$false] %s572_s15 }
  0x1b   : > { %s574_s16 = scalar_lea.vmem %s573_s15, 256  ;;  %p575_p10 = scmp.lt.s32.totalorder %s147_s4, %s573_s15 }
  0x1c   : > { %p570_p6 = pnand %p568_p5, %p556_p3  ;;  %p576_p12 = scmp.lt.s32.totalorder %s574_s16, %s567_s7 }
  0x1e   : > { %p571_p7 = pneg %p570_p6  ;;  %p577_p4 = por %p576_p12, %p575_p10 }
  0x20   : > { %p578_p13 = pnand %p577_p4, %p571_p7 }
  0x22   : > { %581 = shalt.err (!%p578_p13)
}
  0x23   : > { %494 = dma.hbm_to_vmem [thread:$0]  (!%p784_p0), %s144_s30, 128, %s147_s4, %s133_s6  }
  0x24   : > { %p152_p11 = pnand %p470_p1, %p151_p2 }
  0x25   : > { %s799_s18 = sand.u32 (!%p152_p11), 1, %s676_s10  }
  0x26   : > { %155 = sbr.rel (%p152_p11) target bundleno = 101 (0x65), region = 24  ;;  %s471_s19 = sshll.u32 (!%p152_p11), %s799_s18, 3 }
  0x27   : > { %s158_s20 = scalar_lea.sflag (!%p152_p11), [#allocation3], %s799_s18  ;;  %s161_s25 = scalar_lea.vmem (!%p152_p11), [#allocation2], %s471_s19 }
  0x2b   : > { %659 = dma.done.wait (%p760_p8), %s158_s20, 128  }
  0x2c   : > { %661 = vsyncadd (%p760_p8), %s158_s20, 4294967168  ;;  %vm191_vm0 = vcmask 1043456   ;;  %v187_v0 = vld [vmem:[%s161_s25] sm:$0xff]  ;;  %v695_v12 = vmov 1966171168   ;;  %v230_v14 = vlaneseq  ;;  %s472_s21 = sshll.u32 %s799_s18, 1 }
  0x2d   : > { %v189_v1 = vcombine.high %v187_v0, %v187_v0  ;;  %v192_v2 = vsel %vm191_vm0, %v187_v0, 0.0  ;;  %v206_v3 = vsel %vm191_vm0, %v187_v0, -inf  ;;  %v228_v13 = vunpack.c.l.s4 %v695_v12  ;;  %s179_s26 = scalar_lea.vmem [#allocation5], %s472_s21  ;;  %s186_s28 = scalar_lea.vmem [#allocation6], %s472_s21 }
  0x2e   : > { %v193_v4 = vrot.slane %v192_v2, 4  ;;  %v207_v5 = vrot.slane %v206_v3, 4  ;;  %v231_v24 = vshrl.u32 %v230_v14, 7  ;;  %s336_s27 = sshll.u32 %s179_s26, 4  ;;  %s350_s29 = sshll.u32 %s186_s28, 4  ;;  %vm244_vm1 = vcmp.lt.s32.totalorder %v230_v14, 256  ;;  %s809_s27 = int_to_ptr.vmem [resolvable:$true] %s336_s27  ;;  %s811_s29 = int_to_ptr.vmem [resolvable:$true] %s350_s29 }
  0x2f   : > { %v199_v6 = vsel %vm191_vm0, %v189_v1, 0.0  ;;  %v213_v7 = vsel %vm191_vm0, %v189_v1, -inf  ;;  %v229_v23 = vunpack.c.0.s8 %v228_v13  ;;  %s483_s30 = sshll.u32 %s684_s12, 5  ;;  %s317_s8 = scalar_lea.sflag [#allocation4], %s799_s18 }
  0x30   : > { %v194_v8 = vadd.f32 %v193_v4, %v192_v2  ;;  %v200_v9 = vrot.slane %v199_v6, 4  ;;  %v208_v10 = vmax.f32 %v206_v3, %v207_v5  ;;  %v214_v11 = vrot.slane %v213_v7, 4  ;;  %s816_s5 = scalar_lea.hbm %s889_s1, %s483_s30  ;;  %s821_s12 = scalar_lea.hbm %s890_s2, %s483_s30 }
  0x31   : > { %v232_v34 = vsub.s32 %v229_v23, %v231_v24  ;;  %s582_s15 = scalar_lea.vmem %s809_s27, 32  ;;  %s696_s16 = smov [#allocation5]  }
  0x32   : > { %v195_v15 = vrot.slane %v194_v8, 2  ;;  %v201_v16 = vadd.f32 %v200_v9, %v199_v6  ;;  %v209_v17 = vrot.slane %v208_v10, 2  ;;  %v215_v18 = vmax.f32 %v213_v7, %v214_v11  ;;  %p583_p8 = scmp.ne.s32.totalorder %s809_s27, %s582_s15  ;;  %s586_s19 = sshll.u32 %s696_s16, 4  ;;  %s587_s19 = int_to_ptr.vmem [resolvable:$false] %s586_s19 }
  0x33   : > { %s588_s20 = scalar_lea.vmem %s587_s19, 64  ;;  %p589_p0 = scmp.lt.s32.totalorder %s809_s27, %s587_s19 }
  0x34   : > { %v196_v19 = vadd.f32 %v195_v15, %v194_v8  ;;  %v202_v20 = vrot.slane %v201_v16, 2  ;;  %v210_v21 = vmax.f32 %v208_v10, %v209_v17  ;;  %v216_v22 = vrot.slane %v215_v18, 2  ;;  %p584_p11 = pnand %p583_p8, %p764_p9  ;;  %p590_p1 = scmp.lt.s32.totalorder %s588_s20, %s582_s15 }
  0x36   : > { %v197_v25 = vrot.slane %v196_v19, 1  ;;  %v203_v26 = vadd.f32 %v202_v20, %v201_v16  ;;  %v211_v27 = vrot.slane %v210_v21, 1  ;;  %v217_v28 = vmax.f32 %v215_v18, %v216_v22  ;;  %p585_p12 = pneg %p584_p11  ;;  %p591_p2 = por %p590_p1, %p589_p0 }
  0x38   : > { %v198_v29 = vadd.f32 %v197_v25, %v196_v19  ;;  %v204_v30 = vrot.slane %v203_v26, 1  ;;  %v212_v31 = vmax.f32 %v210_v21, %v211_v27  ;;  %v218_v32 = vrot.slane %v217_v28, 1  ;;  %p592_p3 = pnand %p591_p2, %p585_p12 }
  0x3a   : > { %v205_v33 = vadd.f32 %v204_v30, %v203_v26  ;;  %v219_v35 = vmax.f32 %v217_v28, %v218_v32 }
  0x3c   : > { %v226_v36 = vcombine.low %v198_v29, %v205_v33  ;;  %v249_v37 = vcombine.low %v212_v31, %v219_v35 }
  0x3e   : > { %v233_v38 = vrot.slane %v226_v36, %v232_v34  ;;  %v256_v39 = vrot.slane %v249_v37, %v232_v34 }
  0x40   : > { %v240_v40 = vrot.slane %v233_v38, %v232_v34  ;;  %v263_v41 = vrot.slane %v256_v39, %v232_v34 }
  0x42   : > { %246 = vst.msk [vmem:[%s179_s26] sm:$0x3] %vm244_vm1, %v240_v40  ;;  %265 = vst.msk [vmem:[%s186_s28] sm:$0x3] %vm244_vm1, %v263_v41 }
  0x43   : > { %595 = shalt.err (!%p592_p3)
}
  0x44   : > { %s596_s25 = scalar_lea.hbm %s816_s5, 32  ;;  %s600_s28 = scalar_lea.hbm %s889_s1, 64 }
  0x45   : > { %p597_p5 = scmp.ne.s32.totalorder %s816_s5, %s596_s25  ;;  %p601_p10 = scmp.lt.s32.totalorder %s816_s5, %s889_s1 }
  0x46   : > { %p602_p4 = scmp.lt.s32.totalorder %s600_s28, %s596_s25 }
  0x47   : > { %p598_p6 = pnand %p597_p5, %p764_p9 }
  0x48   : > { %p603_p13 = por %p602_p4, %p601_p10 }
  0x49   : > { %p599_p7 = pneg %p598_p6 }
  0x4b   : > { %p604_p8 = pnand %p603_p13, %p599_p7 }
  0x4d   : > { %607 = shalt.err (!%p604_p8)
}
  0x4e   : > { %487 = dma.vmem_to_hbm [thread:$0]  (%p764_p9), %s809_s27, 32, %s816_s5, %s317_s8  }
  0x4f   : > { %s322_s4 = scalar_lea.sflag [#allocation7], %s799_s18  ;;  %s608_s6 = scalar_lea.vmem %s811_s29, 32 }
  0x50   : > { %p609_p11 = scmp.ne.s32.totalorder %s811_s29, %s608_s6  ;;  %s697_s7 = smov [#allocation6]  }
  0x51   : > { %s612_s15 = sshll.u32 %s697_s7, 4  ;;  %s613_s15 = int_to_ptr.vmem [resolvable:$false] %s612_s15 }
  0x52   : > { %p610_p12 = pnand %p609_p11, %p764_p9  ;;  %s614_s16 = scalar_lea.vmem %s613_s15, 64 }
  0x53   : > { %p615_p1 = scmp.lt.s32.totalorder %s811_s29, %s613_s15  ;;  %p616_p2 = scmp.lt.s32.totalorder %s614_s16, %s608_s6 }
  0x54   : > { %p611_p0 = pneg %p610_p12 }
  0x55   : > { %p617_p3 = por %p616_p2, %p615_p1 }
  0x57   : > { %p618_p5 = pnand %p617_p3, %p611_p0 }
  0x59   : > { %621 = shalt.err (!%p618_p5)
}
  0x5a   : > { %s622_s27 = scalar_lea.hbm %s821_s12, 32  ;;  %s626_s8 = scalar_lea.hbm %s890_s2, 64 }
  0x5b   : > { %p623_p6 = scmp.ne.s32.totalorder %s821_s12, %s622_s27  ;;  %p627_p4 = scmp.lt.s32.totalorder %s821_s12, %s890_s2 }
  0x5c   : > { %p628_p13 = scmp.lt.s32.totalorder %s626_s8, %s622_s27 }
  0x5d   : > { %p624_p7 = pnand %p623_p6, %p764_p9 }
  0x5e   : > { %p629_p8 = por %p628_p13, %p627_p4 }
  0x5f   : > { %p625_p10 = pneg %p624_p7 }
  0x61   : > { %p630_p11 = pnand %p629_p8, %p625_p10 }
  0x63   : > { %633 = shalt.err (!%p630_p11)
}
  0x64   : > { %488 = dma.vmem_to_hbm [thread:$0]  (%p764_p9), %s811_s29, 32, %s821_s12, %s322_s4  }
  0x65 PF: > { %s362_s25 = sand.u32 1, %s672_s9   ;;  %p896_p12 = scmp.ne.s32.totalorder %s894_s24, 0 }
  0x66   : > { %p897_p0 = scmp.ge.s32.totalorder %s692_s14, 2  ;;  %s363_s21 = scalar_lea.sflag [#allocation4], %s362_s25 }
  0x68   : > { %p496_p1 = pnand %p897_p0, %p896_p12 }
  0x6a   : > { %p497_p2 = pneg %p496_p1 }
  0x6c   : > { %663 = dma.done.wait (%p497_p2), %s363_s21, 32  }
  0x6d   : > { %665 = vsyncadd (%p497_p2), %s363_s21, 4294967264  ;;  %s372_s26 = scalar_lea.sflag [#allocation7], %s362_s25 }
  0x6e   : > { %667 = dma.done.wait (%p497_p2), %s372_s26, 32  }
  0x6f   : > { %669 = vsyncadd (%p497_p2), %s372_s26, 4294967264  ;;  %s22_s14 = sadd.s32 1, %s692_s14   ;;  %s898_s9 = smov %s676_s10 }
  0x70   : > { %p19_p3 = scmp.ge.s32.totalorder %s22_s14, 4   ;;  %s899_s10 = smov %s680_s11 }
  0x71   : > { %s900_s11 = smov %s769_s23  ;;  %s901_s12 = smov %s688_s13 }
  0x72   : > { %s902_s13 = smov %s904_s17  ;;  %21 = sbr.rel (!%p19_p3) target bundleno = 8 (0x8), region = 94 }
  0x77   :  { %377 = vsyncpa [#allocation3], 1 }
  0x78   :  { %379 = vsyncpa [#allocation3 + $0x1], 1 }
  0x79   :  { %380 = vsyncpa [#allocation4], 1 }
  0x7a   :  { %382 = vsyncpa [#allocation4 + $0x1], 1 }
  0x7b   :  { %383 = vsyncpa [#allocation7], 1 }
  0x7c   :  { %385 = vsyncpa [#allocation7 + $0x1], 1 }

</bundles_post_ra>
